<compile_context>
chip_gen: v7x
topology: tpu7x:2x2x1
jax: 0.10.0
libtpu: 0.0.40
codegen_flags: <defaults>
</compile_context>

<pallas_src>
import functools

import jax
import jax.numpy as jnp
from jax import lax
from jax.experimental import pallas as pl
from jax.experimental.pallas import tpu as pltpu


def _round_up(n, m):
    return ((n + m - 1) // m) * m


def _padded_bytes(shape, itemsize=4):
    """Approximate VMEM footprint of an f32 array under (8, 128) tiling."""
    dims = list(shape) if shape else [1]
    dims[-1] = _round_up(dims[-1], 128)
    if len(dims) >= 2:
        dims[-2] = _round_up(dims[-2], 8)
    total = itemsize
    for d in dims:
        total *= d
    return total


def _make_encoder_kernel(num_layers, hidden_size, seq_len, batch):
    """Build the fused multi-layer LSTM kernel (single invocation, no grid)."""
    H, T, B = hidden_size, seq_len, batch

    def kernel(*refs):
        # refs = [x, (w_ih, w_hh, b) * L, h_n, c_n, seq_scratch, xproj_scratch]
        x_ref = refs[0]                                 # (T*B, D_in) time-major
        w_refs = refs[1:1 + 3 * num_layers]
        hn_ref, cn_ref, seq_ref, xproj_ref = refs[1 + 3 * num_layers:]

        for layer in range(num_layers):
            w_ih_ref = w_refs[3 * layer + 0]            # (D_l, 4H)
            w_hh_ref = w_refs[3 * layer + 1]            # (H, 4H)
            b_ref = w_refs[3 * layer + 2]               # (1, 4H)

            # Layer input: original x for layer 0, previous layer's hidden
            # sequence (VMEM-resident) otherwise.
            x_in = x_ref[...] if layer == 0 else seq_ref[...]

            # Hoisted input projection for ALL timesteps: one big MXU matmul.
            xproj_ref[...] = (
                jnp.dot(x_in, w_ih_ref[...], preferred_element_type=jnp.float32)
                + b_ref[...])                           # (T*B, 4H)

            last_layer = layer == num_layers - 1

            def step(t, carry):
                h_prev, c_prev = carry
                row = t * B
                gates = (xproj_ref[pl.ds(row, B), :]
                         + jnp.dot(h_prev, w_hh_ref[...],
                                   preferred_element_type=jnp.float32))  # (B,4H)
                i = jax.nn.sigmoid(gates[:, 0 * H:1 * H])
                f = jax.nn.sigmoid(gates[:, 1 * H:2 * H])
                g = jnp.tanh(gates[:, 2 * H:3 * H])
                o = jax.nn.sigmoid(gates[:, 3 * H:4 * H])
                c = f * c_prev + i * g
                h = o * jnp.tanh(c)
                if not last_layer:
                    # Only intermediate layers need the hidden sequence, and it
                    # only ever lives in VMEM scratch.
                    seq_ref[pl.ds(row, B), :] = h
                return (h, c)

            h0 = jnp.zeros((B, H), jnp.float32)
            c0 = jnp.zeros((B, H), jnp.float32)
            h_n, c_n = lax.fori_loop(0, T, step, (h0, c0))

            # Single final-state store per layer (no per-timestep rewrites).
            hn_ref[:, layer, :] = h_n
            cn_ref[:, layer, :] = c_n

    return kernel


def init_encoder_params(key, input_size, hidden_size, num_layers):
    """Deterministic params matching nn.LSTM shapes (gate order i,f,g,o).

    Stored pre-transposed: (D, 4H), (H, 4H), and bias_ih + bias_hh as (1, 4H).
    """
    params = []
    k = 1.0 / jnp.sqrt(hidden_size)
    for layer in range(num_layers):
        d_in = input_size if layer == 0 else hidden_size
        key, k1, k2, k3, k4 = jax.random.split(key, 5)
        w_ih = jax.random.uniform(k1, (4 * hidden_size, d_in), jnp.float32, -k, k)
        w_hh = jax.random.uniform(k2, (4 * hidden_size, hidden_size), jnp.float32, -k, k)
        b_ih = jax.random.uniform(k3, (4 * hidden_size,), jnp.float32, -k, k)
        b_hh = jax.random.uniform(k4, (4 * hidden_size,), jnp.float32, -k, k)
        params.append((w_ih.T, w_hh.T, (b_ih + b_hh).reshape(1, -1)))
    return params


@functools.partial(jax.jit, static_argnames=("hidden_size",))
def encoder_forward(x, params, hidden_size):
    """x: (B, T, input_size). Returns (h_n, c_n), each (B, num_layers, H)."""
    B, T, D = x.shape
    H = hidden_size
    L = len(params)

    # Single tiny layout change on the raw input (time-major rows, flattened to
    # a lane-dense 2-D slab). All inter-layer activations stay in VMEM.
    x_2d = jnp.transpose(x, (1, 0, 2)).astype(jnp.float32).reshape(T * B, D)

    flat_weights = []
    for (w_ih_t, w_hh_t, bias) in params:
        flat_weights.extend((w_ih_t.astype(jnp.float32),
                             w_hh_t.astype(jnp.float32),
                             bias.astype(jnp.float32)))

    kernel = _make_encoder_kernel(L, H, T, B)

    vmem = pltpu.MemorySpace.VMEM
    in_specs = [pl.BlockSpec(memory_space=vmem)] * (1 + 3 * L)
    out_specs = (pl.BlockSpec(memory_space=vmem),
                 pl.BlockSpec(memory_space=vmem))
    out_shape = (jax.ShapeDtypeStruct((B, L, H), jnp.float32),   # h_n
                 jax.ShapeDtypeStruct((B, L, H), jnp.float32))   # c_n
    scratch_shapes = [
        pltpu.VMEM((T * B, H), jnp.float32),       # inter-layer hidden sequence
        pltpu.VMEM((T * B, 4 * H), jnp.float32),   # hoisted input projection
    ]

    # Explicit VMEM budget (portable to v7x's 64 MiB per TensorCore).
    footprint = _padded_bytes((T * B, D))
    for w in flat_weights:
        footprint += _padded_bytes(w.shape)
    footprint += 2 * _padded_bytes((B, L, H))
    footprint += _padded_bytes((T * B, H)) + _padded_bytes((T * B, 4 * H))
    vmem_limit = int(min(max(2 * footprint + (4 << 20), 32 << 20), 64 << 20))

    h_n, c_n = pl.pallas_call(
        kernel,
        out_shape=out_shape,
        in_specs=in_specs,
        out_specs=out_specs,
        scratch_shapes=scratch_shapes,
        compiler_params=pltpu.CompilerParams(vmem_limit_bytes=vmem_limit),
    )(x_2d, *flat_weights)

    return h_n, c_n


def _reference_forward(x, params, hidden_size):
    """Pure-JAX LSTM reference (lax.scan) for correctness checking."""
    x_tbd = jnp.transpose(x, (1, 0, 2)).astype(jnp.float32)
    H = hidden_size
    h_list, c_list = [], []
    for (w_ih_t, w_hh_t, bias) in params:
        B = x_tbd.shape[1]
        h0 = jnp.zeros((B, H), jnp.float32)
        c0 = jnp.zeros((B, H), jnp.float32)

        def step(carry, x_t):
            h, c = carry
            gates = x_t @ w_ih_t + h @ w_hh_t + bias
            i = jax.nn.sigmoid(gates[:, 0 * H:1 * H])
            f = jax.nn.sigmoid(gates[:, 1 * H:2 * H])
            g = jnp.tanh(gates[:, 2 * H:3 * H])
            o = jax.nn.sigmoid(gates[:, 3 * H:4 * H])
            c = f * c + i * g
            h = o * jnp.tanh(c)
            return (h, c), h

        (h_n, c_n), y = lax.scan(step, (h0, c0), x_tbd)
        h_list.append(h_n)
        c_list.append(c_n)
        x_tbd = y
    return jnp.stack(h_list, axis=1), jnp.stack(c_list, axis=1)   # (B, L, H)


if __name__ == "__main__":
    B, T = 2, 8
    INPUT_SIZE, HIDDEN_SIZE, NUM_LAYERS = 16, 32, 2

    key = jax.random.PRNGKey(0)
    kx, kp = jax.random.split(key)
    x = jax.random.normal(kx, (B, T, INPUT_SIZE), jnp.float32)
    params = init_encoder_params(kp, INPUT_SIZE, HIDDEN_SIZE, NUM_LAYERS)

    h_n, c_n = encoder_forward(x, params, HIDDEN_SIZE)
    h_n = jax.block_until_ready(h_n)
    c_n = jax.block_until_ready(c_n)

    assert h_n.shape == (B, NUM_LAYERS, HIDDEN_SIZE)
    assert c_n.shape == (B, NUM_LAYERS, HIDDEN_SIZE)

    h_ref, c_ref = _reference_forward(x, params, HIDDEN_SIZE)
    assert jnp.allclose(h_n, h_ref, atol=1e-5, rtol=1e-5)
    assert jnp.allclose(c_n, c_ref, atol=1e-5, rtol=1e-5)

    print("KERNEL_OK")
</pallas_src>

<mosaic_0001>
module attributes {stable_mosaic.version = 11 : i64} {
  func.func @kernel(%arg0: memref<16x16xf32, #tpu.memory_space<vmem>>, %arg1: memref<16x128xf32, #tpu.memory_space<vmem>>, %arg2: memref<32x128xf32, #tpu.memory_space<vmem>>, %arg3: memref<1x128xf32, #tpu.memory_space<vmem>>, %arg4: memref<32x128xf32, #tpu.memory_space<vmem>>, %arg5: memref<32x128xf32, #tpu.memory_space<vmem>>, %arg6: memref<1x128xf32, #tpu.memory_space<vmem>>, %arg7: memref<2x2x32xf32, #tpu.memory_space<vmem>>, %arg8: memref<2x2x32xf32, #tpu.memory_space<vmem>>, %arg9: memref<16x32xf32, #tpu.memory_space<vmem>>, %arg10: memref<16x128xf32, #tpu.memory_space<vmem>>) attributes {dimension_semantics = [], scalar_prefetch = 0 : i64, scratch_operands = 2 : i64, tpu.core_type = #tpu.core_type<tc>} {
    %c0 = arith.constant 0 : index
    %c0_0 = arith.constant 0 : index
    %0 = vector.load %arg0[%c0, %c0_0] : memref<16x16xf32, #tpu.memory_space<vmem>>, vector<16x16xf32>
    %c0_1 = arith.constant 0 : index
    %c0_2 = arith.constant 0 : index
    %1 = vector.load %arg1[%c0_1, %c0_2] : memref<16x128xf32, #tpu.memory_space<vmem>>, vector<16x128xf32>
    %cst = arith.constant dense<0.000000e+00> : vector<16x128xf32>
    %2 = tpu.matmul %0, %1, %cst {dimension_numbers = #tpu.dot_dimension_numbers<[1], [0], [0], [1], [0, 0, 1, 1], [], []>} : vector<16x16xf32>, vector<16x128xf32>, vector<16x128xf32> -> vector<16x128xf32>
    %c0_3 = arith.constant 0 : index
    %c0_4 = arith.constant 0 : index
    %3 = vector.load %arg3[%c0_3, %c0_4] : memref<1x128xf32, #tpu.memory_space<vmem>>, vector<1x128xf32>
    %4 = vector.broadcast %3 : vector<1x128xf32> to vector<16x128xf32>
    %5 = arith.addf %2, %4 : vector<16x128xf32>
    %c0_5 = arith.constant 0 : index
    %c0_6 = arith.constant 0 : index
    %6 = vector.load %arg10[%c0_5, %c0_6] : memref<16x128xf32, #tpu.memory_space<vmem>>, vector<16x128xf32>
    tpu.vector_store %arg10[%c0_5, %c0_6], %5 {strides = array<i32>} : memref<16x128xf32, #tpu.memory_space<vmem>>, vector<16x128xf32>,
    %cst_7 = arith.constant 0.000000e+00 : f32
    %7 = vector.broadcast %cst_7 : f32 to vector<2x32xf32>
    %cst_8 = arith.constant 0.000000e+00 : f32
    %8 = vector.broadcast %cst_8 : f32 to vector<2x32xf32>
    %c0_i32 = arith.constant 0 : i32
    %c8_i32 = arith.constant 8 : i32
    %9 = arith.addi %c0_i32, %c8_i32 : i32
    %c1_i32 = arith.constant 1 : i32
    %10:2 = scf.for %arg11 = %c0_i32 to %9 step %c1_i32 iter_args(%arg12 = %7, %arg13 = %8) -> (vector<2x32xf32>, vector<2x32xf32>)  : i32 {
      %c2_i32 = arith.constant 2 : i32
      %34 = arith.muli %arg11, %c2_i32 : i32
      %35 = arith.index_cast %34 : i32 to index
      %c0_36 = arith.constant 0 : index
      %36 = vector.load %arg10[%35, %c0_36] : memref<16x128xf32, #tpu.memory_space<vmem>>, vector<2x128xf32>
      %c0_37 = arith.constant 0 : index
      %c0_38 = arith.constant 0 : index
      %37 = vector.load %arg2[%c0_37, %c0_38] : memref<32x128xf32, #tpu.memory_space<vmem>>, vector<32x128xf32>
      %cst_39 = arith.constant dense<0.000000e+00> : vector<2x128xf32>
      %38 = tpu.matmul %arg12, %37, %cst_39 {dimension_numbers = #tpu.dot_dimension_numbers<[1], [0], [0], [1], [0, 0, 1, 1], [], []>} : vector<2x32xf32>, vector<32x128xf32>, vector<2x128xf32> -> vector<2x128xf32>
      %39 = arith.addf %36, %38 : vector<2x128xf32>
      %40 = vector.extract_strided_slice %39 {offsets = [0, 0], sizes = [2, 32], strides = [1, 1]} : vector<2x128xf32> to vector<2x32xf32>
      %41 = arith.negf %40 : vector<2x32xf32>
      %42 = math.exp %41 : vector<2x32xf32>
      %cst_40 = arith.constant 1.000000e+00 : f32
      %43 = vector.broadcast %cst_40 : f32 to vector<2x32xf32>
      %44 = arith.addf %43, %42 : vector<2x32xf32>
      %45 = arith.divf %43, %44 : vector<2x32xf32>
      %46 = vector.extract_strided_slice %39 {offsets = [0, 32], sizes = [2, 32], strides = [1, 1]} : vector<2x128xf32> to vector<2x32xf32>
      %47 = arith.negf %46 : vector<2x32xf32>
      %48 = math.exp %47 : vector<2x32xf32>
      %cst_41 = arith.constant 1.000000e+00 : f32
      %49 = vector.broadcast %cst_41 : f32 to vector<2x32xf32>
      %50 = arith.addf %49, %48 : vector<2x32xf32>
      %51 = arith.divf %49, %50 : vector<2x32xf32>
      %52 = vector.extract_strided_slice %39 {offsets = [0, 64], sizes = [2, 32], strides = [1, 1]} : vector<2x128xf32> to vector<2x32xf32>
      %53 = math.tanh %52 : vector<2x32xf32>
      %54 = vector.extract_strided_slice %39 {offsets = [0, 96], sizes = [2, 32], strides = [1, 1]} : vector<2x128xf32> to vector<2x32xf32>
      %55 = arith.negf %54 : vector<2x32xf32>
      %56 = math.exp %55 : vector<2x32xf32>
      %cst_42 = arith.constant 1.000000e+00 : f32
      %57 = vector.broadcast %cst_42 : f32 to vector<2x32xf32>
      %58 = arith.addf %57, %56 : vector<2x32xf32>
      %59 = arith.divf %57, %58 : vector<2x32xf32>
      %60 = arith.mulf %51, %arg13 : vector<2x32xf32>
      %61 = arith.mulf %45, %53 : vector<2x32xf32>
      %62 = arith.addf %60, %61 : vector<2x32xf32>
      %63 = math.tanh %62 : vector<2x32xf32>
      %64 = arith.mulf %59, %63 : vector<2x32xf32>
      %65 = arith.index_cast %34 : i32 to index
      %c0_43 = arith.constant 0 : index
      %66 = vector.load %arg9[%65, %c0_43] : memref<16x32xf32, #tpu.memory_space<vmem>>, vector<2x32xf32>
      tpu.vector_store %arg9[%65, %c0_43], %64 {strides = array<i32>} : memref<16x32xf32, #tpu.memory_space<vmem>>, vector<2x32xf32>,
      scf.yield %64, %62 : vector<2x32xf32>, vector<2x32xf32>
    }
    %c8_i32_9 = arith.constant 8 : i32
    %c0_10 = arith.constant 0 : index
    %c0_11 = arith.constant 0 : index
    %c0_12 = arith.constant 0 : index
    %11 = vector.load %arg7[%c0_10, %c0_11, %c0_12] : memref<2x2x32xf32, #tpu.memory_space<vmem>>, vector<2x1x32xf32>
    %12 = vector.shape_cast %11 : vector<2x1x32xf32> to vector<2x32xf32>
    %13 = vector.shape_cast %10#0 : vector<2x32xf32> to vector<2x1x32xf32>
    tpu.vector_store %arg7[%c0_10, %c0_11, %c0_12], %13 {strides = array<i32>} : memref<2x2x32xf32, #tpu.memory_space<vmem>>, vector<2x1x32xf32>,
    %c0_13 = arith.constant 0 : index
    %c0_14 = arith.constant 0 : index
    %c0_15 = arith.constant 0 : index
    %14 = vector.load %arg8[%c0_13, %c0_14, %c0_15] : memref<2x2x32xf32, #tpu.memory_space<vmem>>, vector<2x1x32xf32>
    %15 = vector.shape_cast %14 : vector<2x1x32xf32> to vector<2x32xf32>
    %16 = vector.shape_cast %10#1 : vector<2x32xf32> to vector<2x1x32xf32>
    tpu.vector_store %arg8[%c0_13, %c0_14, %c0_15], %16 {strides = array<i32>} : memref<2x2x32xf32, #tpu.memory_space<vmem>>, vector<2x1x32xf32>,
    %c0_16 = arith.constant 0 : index
    %c0_17 = arith.constant 0 : index
    %17 = vector.load %arg9[%c0_16, %c0_17] : memref<16x32xf32, #tpu.memory_space<vmem>>, vector<16x32xf32>
    %c0_18 = arith.constant 0 : index
    %c0_19 = arith.constant 0 : index
    %18 = vector.load %arg4[%c0_18, %c0_19] : memref<32x128xf32, #tpu.memory_space<vmem>>, vector<32x128xf32>
    %cst_20 = arith.constant dense<0.000000e+00> : vector<16x128xf32>
    %19 = tpu.matmul %17, %18, %cst_20 {dimension_numbers = #tpu.dot_dimension_numbers<[1], [0], [0], [1], [0, 0, 1, 1], [], []>} : vector<16x32xf32>, vector<32x128xf32>, vector<16x128xf32> -> vector<16x128xf32>
    %c0_21 = arith.constant 0 : index
    %c0_22 = arith.constant 0 : index
    %20 = vector.load %arg6[%c0_21, %c0_22] : memref<1x128xf32, #tpu.memory_space<vmem>>, vector<1x128xf32>
    %21 = vector.broadcast %20 : vector<1x128xf32> to vector<16x128xf32>
    %22 = arith.addf %19, %21 : vector<16x128xf32>
    %c0_23 = arith.constant 0 : index
    %c0_24 = arith.constant 0 : index
    %23 = vector.load %arg10[%c0_23, %c0_24] : memref<16x128xf32, #tpu.memory_space<vmem>>, vector<16x128xf32>
    tpu.vector_store %arg10[%c0_23, %c0_24], %22 {strides = array<i32>} : memref<16x128xf32, #tpu.memory_space<vmem>>, vector<16x128xf32>,
    %cst_25 = arith.constant 0.000000e+00 : f32
    %24 = vector.broadcast %cst_25 : f32 to vector<2x32xf32>
    %cst_26 = arith.constant 0.000000e+00 : f32
    %25 = vector.broadcast %cst_26 : f32 to vector<2x32xf32>
    %c0_i32_27 = arith.constant 0 : i32
    %c8_i32_28 = arith.constant 8 : i32
    %26 = arith.addi %c0_i32_27, %c8_i32_28 : i32
    %c1_i32_29 = arith.constant 1 : i32
    %27:2 = scf.for %arg11 = %c0_i32_27 to %26 step %c1_i32_29 iter_args(%arg12 = %24, %arg13 = %25) -> (vector<2x32xf32>, vector<2x32xf32>)  : i32 {
      %c2_i32 = arith.constant 2 : i32
      %34 = arith.muli %arg11, %c2_i32 : i32
      %35 = arith.index_cast %34 : i32 to index
      %c0_36 = arith.constant 0 : index
      %36 = vector.load %arg10[%35, %c0_36] : memref<16x128xf32, #tpu.memory_space<vmem>>, vector<2x128xf32>
      %c0_37 = arith.constant 0 : index
      %c0_38 = arith.constant 0 : index
      %37 = vector.load %arg5[%c0_37, %c0_38] : memref<32x128xf32, #tpu.memory_space<vmem>>, vector<32x128xf32>
      %cst_39 = arith.constant dense<0.000000e+00> : vector<2x128xf32>
      %38 = tpu.matmul %arg12, %37, %cst_39 {dimension_numbers = #tpu.dot_dimension_numbers<[1], [0], [0], [1], [0, 0, 1, 1], [], []>} : vector<2x32xf32>, vector<32x128xf32>, vector<2x128xf32> -> vector<2x128xf32>
      %39 = arith.addf %36, %38 : vector<2x128xf32>
      %40 = vector.extract_strided_slice %39 {offsets = [0, 0], sizes = [2, 32], strides = [1, 1]} : vector<2x128xf32> to vector<2x32xf32>
      %41 = arith.negf %40 : vector<2x32xf32>
      %42 = math.exp %41 : vector<2x32xf32>
      %cst_40 = arith.constant 1.000000e+00 : f32
      %43 = vector.broadcast %cst_40 : f32 to vector<2x32xf32>
      %44 = arith.addf %43, %42 : vector<2x32xf32>
      %45 = arith.divf %43, %44 : vector<2x32xf32>
      %46 = vector.extract_strided_slice %39 {offsets = [0, 32], sizes = [2, 32], strides = [1, 1]} : vector<2x128xf32> to vector<2x32xf32>
      %47 = arith.negf %46 : vector<2x32xf32>
      %48 = math.exp %47 : vector<2x32xf32>
      %cst_41 = arith.constant 1.000000e+00 : f32
      %49 = vector.broadcast %cst_41 : f32 to vector<2x32xf32>
      %50 = arith.addf %49, %48 : vector<2x32xf32>
      %51 = arith.divf %49, %50 : vector<2x32xf32>
      %52 = vector.extract_strided_slice %39 {offsets = [0, 64], sizes = [2, 32], strides = [1, 1]} : vector<2x128xf32> to vector<2x32xf32>
      %53 = math.tanh %52 : vector<2x32xf32>
      %54 = vector.extract_strided_slice %39 {offsets = [0, 96], sizes = [2, 32], strides = [1, 1]} : vector<2x128xf32> to vector<2x32xf32>
      %55 = arith.negf %54 : vector<2x32xf32>
      %56 = math.exp %55 : vector<2x32xf32>
      %cst_42 = arith.constant 1.000000e+00 : f32
      %57 = vector.broadcast %cst_42 : f32 to vector<2x32xf32>
      %58 = arith.addf %57, %56 : vector<2x32xf32>
      %59 = arith.divf %57, %58 : vector<2x32xf32>
      %60 = arith.mulf %51, %arg13 : vector<2x32xf32>
      %61 = arith.mulf %45, %53 : vector<2x32xf32>
      %62 = arith.addf %60, %61 : vector<2x32xf32>
      %63 = math.tanh %62 : vector<2x32xf32>
      %64 = arith.mulf %59, %63 : vector<2x32xf32>
      scf.yield %64, %62 : vector<2x32xf32>, vector<2x32xf32>
    }
    %c8_i32_30 = arith.constant 8 : i32
    %c0_31 = arith.constant 0 : index
    %c1 = arith.constant 1 : index
    %c0_32 = arith.constant 0 : index
    %28 = vector.load %arg7[%c0_31, %c1, %c0_32] : memref<2x2x32xf32, #tpu.memory_space<vmem>>, vector<2x1x32xf32>
    %29 = vector.shape_cast %28 : vector<2x1x32xf32> to vector<2x32xf32>
    %30 = vector.shape_cast %27#0 : vector<2x32xf32> to vector<2x1x32xf32>
    tpu.vector_store %arg7[%c0_31, %c1, %c0_32], %30 {strides = array<i32>} : memref<2x2x32xf32, #tpu.memory_space<vmem>>, vector<2x1x32xf32>,
    %c0_33 = arith.constant 0 : index
    %c1_34 = arith.constant 1 : index
    %c0_35 = arith.constant 0 : index
    %31 = vector.load %arg8[%c0_33, %c1_34, %c0_35] : memref<2x2x32xf32, #tpu.memory_space<vmem>>, vector<2x1x32xf32>
    %32 = vector.shape_cast %31 : vector<2x1x32xf32> to vector<2x32xf32>
    %33 = vector.shape_cast %27#1 : vector<2x32xf32> to vector<2x1x32xf32>
    tpu.vector_store %arg8[%c0_33, %c1_34, %c0_35], %33 {strides = array<i32>} : memref<2x2x32xf32, #tpu.memory_space<vmem>>, vector<2x1x32xf32>,
    return
  }
}

</mosaic_0001>

<bundles_post_ra>
// kernel: encoder_forward.1
= control target key start
LH: loop header
LB: loop body
LE: loop exit
PB: predicated region body
PF: predicated region fallthrough
CT: control target
= control target key end

     0   :  { %14 = vsyncpa [#allocation5], 0  ;;  %s1319_s0 = inlined_call_operand.vmem [shape: f32[16,16], index: 0, kind: input, shape index: {}]   ;;  %s1320_s1 = inlined_call_operand.hbm [shape: f32[16,128], index: 1, kind: input, shape index: {}]   ;;  %s1321_s2 = inlined_call_operand.vmem [shape: f32[32,128], index: 2, kind: input, shape index: {}]   ;;  %s1322_s3 = inlined_call_operand.vmem [shape: f32[1,128], index: 3, kind: input, shape index: {}]   ;;  %s1323_s4 = inlined_call_operand.hbm [shape: f32[32,128], index: 4, kind: input, shape index: {}]   ;;  %s1324_s5 = inlined_call_operand.hbm [shape: f32[32,128], index: 5, kind: input, shape index: {}]   ;;  %s1325_s6 = inlined_call_operand.vmem [shape: f32[1,128], index: 6, kind: input, shape index: {}]   ;;  %s1326_s7 = inlined_call_operand.hbm [shape: f32[2,2,32], index: 7, kind: output, shape index: {0}]   ;;  %s1327_s8 = inlined_call_operand.hbm [shape: f32[2,2,32], index: 8, kind: output, shape index: {1}]  }
   0x1   :  { %15 = vsyncpa [#allocation8], 0 }
   0x2   :  { %16 = vsyncpa [#allocation6], 0 }
   0x3   :  { %17 = vsyncpa [#allocation12], 0  ;;  %s1067_s27 = smov [#allocation7]   ;;  %s1068_s29 = smov [#allocation4]  }
   0x4   :  { %s41_s28 = sshll.u32 %s1067_s27, 4  ;;  %s25_s30 = sshll.u32 %s1068_s29, 4  ;;  %s42_s28 = int_to_ptr.vmem [resolvable:$true] %s41_s28  ;;  %s1133_s30 = int_to_ptr.vmem [resolvable:$true] %s25_s30 }
   0x5   :  { %s901_s11 = scalar_lea.hbm %s1323_s4, 512 }
   0x6   :  { %p902_p0 = scmp.ne.s32.totalorder %s1323_s4, %s901_s11  ;;  %p905_p1 = scmp.lt.u32.totalorder %s901_s11, %s1323_s4 }
   0x8   :  { %p907_p2 = pnand %p905_p1, %p902_p0 }
   0xa   :  { %910 = shalt.err (!%p907_p2)
}
   0xb   :  { %s911_s16 = scalar_lea.vmem %s42_s28, 512  ;;  %p916_p4 = scmp.lt.s32.totalorder %s42_s28, %s42_s28 }
   0xc   :  { %p912_p3 = scmp.ne.s32.totalorder %s42_s28, %s911_s16  ;;  %p917_p5 = scmp.lt.s32.totalorder %s911_s16, %s911_s16 }
   0xe   :  { %p918_p6 = por %p917_p5, %p916_p4 }
  0x10   :  { %p919_p7 = pnand %p918_p6, %p912_p3 }
  0x12   :  { %922 = shalt.err (!%p919_p7)
}
  0x13   :  { %s1069_s17 = smov 128   ;;  %s1070_s18 = smov 8  }
  0x14   :  { %47 = dma.hbm_to_vmem [thread:$0]  %s1323_s4, 512, %s42_s28, [#allocation8], %s1069_s17, %s1069_s17, %s1070_s18  }
  0x15   :  { %s923_s23 = scalar_lea.hbm %s1320_s1, 256 }
  0x16   :  { %p924_p8 = scmp.ne.s32.totalorder %s1320_s1, %s923_s23  ;;  %p927_p9 = scmp.lt.u32.totalorder %s923_s23, %s1320_s1 }
  0x18   :  { %p929_p10 = pnand %p927_p9, %p924_p8 }
  0x1a   :  { %932 = shalt.err (!%p929_p10)
}
  0x1b   :  { %s933_s29 = scalar_lea.vmem %s1133_s30, 256  ;;  %p938_p12 = scmp.lt.s32.totalorder %s1133_s30, %s1133_s30 }
  0x1c   :  { %p934_p11 = scmp.ne.s32.totalorder %s1133_s30, %s933_s29  ;;  %p939_p13 = scmp.lt.s32.totalorder %s933_s29, %s933_s29 }
  0x1e   :  { %p940_p0 = por %p939_p13, %p938_p12 }
  0x20   :  { %p941_p1 = pnand %p940_p0, %p934_p11 }
  0x22   :  { %944 = shalt.err (!%p941_p1)
}
  0x23   :  { %31 = dma.hbm_to_vmem [thread:$0]  %s1320_s1, 256, %s1133_s30, [#allocation5], %s1069_s17, %s1069_s17, %s1070_s18  }
  0x24   :  { %s1071_s9 = smov [#allocation9]   ;;  %s945_s13 = scalar_lea.hbm %s1324_s5, 512 }
  0x25   :  { %s53_s10 = sshll.u32 %s1071_s9, 4  ;;  %p946_p2 = scmp.ne.s32.totalorder %s1324_s5, %s945_s13  ;;  %s54_s10 = int_to_ptr.vmem [resolvable:$true] %s53_s10 }
  0x26   :  { %p949_p3 = scmp.lt.u32.totalorder %s945_s13, %s1324_s5 }
  0x28   :  { %p951_p4 = pnand %p949_p3, %p946_p2 }
  0x2a   :  { %954 = shalt.err (!%p951_p4)
}
  0x2b   :  { %s955_s20 = scalar_lea.vmem %s54_s10, 512  ;;  %p960_p6 = scmp.lt.s32.totalorder %s54_s10, %s54_s10 }
  0x2c   :  { %p956_p5 = scmp.ne.s32.totalorder %s54_s10, %s955_s20  ;;  %p961_p7 = scmp.lt.s32.totalorder %s955_s20, %s955_s20 }
  0x2e   :  { %p962_p8 = por %p961_p7, %p960_p6 }
  0x30   :  { %p963_p9 = pnand %p962_p8, %p956_p5 }
  0x32   :  { %966 = shalt.err (!%p963_p9)
}
  0x33   :  { %59 = dma.hbm_to_vmem [thread:$0]  %s1324_s5, 512, %s54_s10, [#allocation8], %s1069_s17, %s1069_s17, %s1070_s18  }
  0x34   :  { %1035 = dma.done.wait [#allocation5], 256  }
  0x35   :  { %1036 = vsyncadd [#allocation5], 4294967040 }
  0x36   :  { %1037 = dma.done.wait [#allocation8], 1024  }
  0x37   :  { %1038 = vsyncadd [#allocation8], 4294966272  ;;  %vm82_vm0 = vcmask 130048   ;;  %v73_v0 = vld [vmem:[#allocation4] sm:$0xff]  ;;  %v74_v1 = vld [vmem:[#allocation4 + $0x8] sm:$0xff]  ;;  %v1194_v10 = vmov 0.0  }
  0x38   :  { %v71_v2 = vld [vmem:[%s1319_s0] sm:$0xff]  ;;  %v792_v3 = vpack.c.bf16 %v74_v1, %v73_v0  ;;  %v72_v4 = vld [vmem:[%s1319_s0 + $0x8] sm:$0xff]  ;;  %v1196_v11 = vmov 0.0   ;;  %s1198_s18 = smov 0  }
  0x39   :  { %756 = vmatprep.mubr.msk.f32.mxu0 %vm82_vm0, %v71_v2  ;;  %v720_v5 = vld [vmem:[%s1322_s3] ss:$0 sm:$0xff] }
  0x3a   :  { %793 = vmatprep.subr.bf16.mxu0 %v792_v3 }
  0x3b   :  { %795 = vmatpush3.bf16.msra.mxu0 %v792_v3 }
  0x3e   :  { %757 = vmatmul.mubr.msk.f32.vlgmr.msra.gmra.mrb[0].mxu0 %vm82_vm0, %v72_v4 }
 0x111   :  { %v758_v6 = vpop.f32.mrb[0].mxu0 }
 0x112   :  { %v161_v7 = vadd.f32 %v758_v6, %v720_v5  ;;  %v155_v8 = vpop.f32.mrb[1].mxu0 }
 0x113   :  { %v156_v9 = vadd.f32 %v720_v5, %v155_v8 }
 0x114   :  { %165 = vst [vmem:[#allocation3 + $0x8] sm:$0xff] %v161_v7 }
 0x115   :  { %164 = vst [vmem:[#allocation3] sm:$0xff] %v156_v9 }
 0x116 LB: > { %v177_v12 = vld [vmem:[%s1321_s2] sm:$0xff]  ;;  %v178_v13 = vld [vmem:[%s1321_s2 + $0x8] sm:$0xff]  ;;  %v179_v14 = vld [vmem:[%s1321_s2 + $0x10] sm:$0xff]  ;;  %v1072_v15 = vmov 0.0|0.0   ;;  %s1073_s9 = smov 32   ;;  %vm1074_vm1 = vmmov 0   ;;  %s1053_s18 = sphi %s1198_s18, %s171_s18   ;;  %v1049_v11 = vphi %v1196_v11, %v1329_v11   ;;  %v1045_v10 = vphi %v1194_v10, %v1328_v10  }
 0x117   : > { %796 = vmatprep.subr.bf16.mxu0 %v1072_v15  ;;  %v797_v16 = vpack.c.bf16 %v178_v13, %v177_v12  ;;  %v180_v17 = vld [vmem:[%s1321_s2 + $0x18] sm:$0xff]  ;;  %182 = vrot.lane.b32.xlu0 %v1049_v11, %s1073_s9  ;;  %v1075_v18 = vmov 0.0   ;;  %vm184_vm2 = vcmask 261120   ;;  %s723_s10 = sshll.u32 %s1053_s18, 1  ;;  %s1076_s12 = smov 64   ;;  %vm287_vm3 = vcmask 254976  }
 0x118   : > { %767 = vmatprep.mubr.msk.f32.mxu0 %vm1074_vm1, %v1075_v18  ;;  %v800_v19 = vpack.c.bf16 %v180_v17, %v179_v14  ;;  %s175_s11 = scalar_lea.vmem [#allocation3], %s723_s10  ;;  %s286_s13 = scalar_lea.vmem [#allocation2], %s723_s10 }
 0x119   : > { %798 = vmatpush3.bf16.msra.mxu0 %v797_v16  ;;  %s171_s18 = sadd.s32 1, %s1053_s18  }
 0x11a   : > { %799 = vmatprep.subr.bf16.mxu0 %v1072_v15  ;;  %p168_p10 = scmp.ge.s32.totalorder %s171_s18, 8  }
 0x11b   :  { %v370_v39 = vld [vmem:[#allocation7] sm:$0xff] (%p168_p10)  ;;  %v371_v40 = vld [vmem:[#allocation7 + $0x8] sm:$0xff] (%p168_p10)  ;;  %v372_v41 = vld [vmem:[#allocation7 + $0x10] sm:$0xff] (%p168_p10)  ;;  %v293_v42 = vlaneseq (%p168_p10)  ;;  %v1077_v46 = vmov (%p168_p10), 1966171168   ;;  %s1078_s2 = smov (%p168_p10), 96  }
 0x11c   : > { %v176_v21 = vld [vmem:[%s175_s11] sm:$0x3]  ;;  %v802_v43 = vpack.c.bf16 (%p168_p10), %v371_v40, %v370_v39  ;;  %v373_v44 = vld [vmem:[#allocation7 + $0x18] sm:$0xff] (%p168_p10)  ;;  %v291_v47 = vunpack.c.l.s4 (%p168_p10), %v1077_v46  ;;  %s1079_s14 = smov (%p168_p10), 32   ;;  %vm326_vm4 = vcmask (%p168_p10), 253952   ;;  %v1059_v12 = vmov (%p168_p10), 0.0  }
 0x11d   : > { %801 = vmatpush3.bf16.msra.mxu0 %v800_v19  ;;  %v806_v48 = vpack.c.bf16 (%p168_p10), %v373_v44, %v372_v41  ;;  %v294_v49 = vshrl.u32 (%p168_p10), %v293_v42, 7  ;;  %v726_v6 = vld [vmem:[%s1325_s6] ss:$0 sm:$0xff] (%p168_p10)  ;;  %s1256_s19 = smov (%p168_p10), 0  }
 0x11e   :  { %803 = vmatprep.subr.bf16.mxu0 (%p168_p10), %v802_v43  ;;  %v292_v50 = vunpack.c.0.s8 (%p168_p10), %v291_v47 }
 0x11f   :  { %v1232_v52 = vsub.s32 (%p168_p10), 0, %v294_v49 }
 0x120   :  { %v1230_v51 = vsub.s32 (%p168_p10), %v292_v50, %v294_v49 }
 0x189   : > { %v183_v20 = vpop.permute.xlu0 %182 }
 0x18a   : > { %768 = vmatmul.mubr.msk.f32.vlgmr.msra.gmra.mrb[0].mxu0 %vm184_vm2, %v183_v20 }
 0x18b   :  { %805 = vmatpush3.bf16.msra.mxu0 (%p168_p10), %v802_v43 }
 0x18c   :  { %807 = vmatprep.subr.bf16.mxu0 (%p168_p10), %v806_v48 }
 0x18f   :  { %809 = vmatpush3.bf16.msra.mxu0 (%p168_p10), %v806_v48 }
 0x25d   : > { %v253_v22 = vpop.f32.mrb[0].mxu0 }
 0x25e   : > { %v257_v23 = vadd.f32 %v253_v22, %v176_v21  ;;  %v769_v24 = vpop.f32.mrb[1].mxu0 }
 0x260   : > { %885 = vtanh.f32 %v257_v23  ;;  %v725_v26 = vmul.f32 -1.442695, %v257_v23 }
 0x262   : > { %887 = vpow2.f32 %v725_v26 }
 0x26a   : > { %v886_v25 = vpop.eup %885 }
 0x26b   : > { %267 = vrot.lane.b32.xlu0 %v886_v25, %s1076_s12 }
 0x26c   : > { %v888_v27 = vpop.eup %887 }
 0x26d   : > { %v261_v28 = vadd.f32 1.0, %v888_v27 }
 0x26f   : > { %889 = vrcp.f32 %v261_v28 }
 0x279   : > { %v890_v29 = vpop.eup %889 }
 0x27a   : > { %v265_v32 = vmul.f32 %v1045_v10, %v890_v29 }
 0x2dd   : > { %v268_v30 = vpop.permute.xlu0 %267 }
 0x2de   : > { %v270_v31 = vmul.f32 %v890_v29, %v268_v30 }
 0x2e0   : > { %272 = vrot.lane.b32.xlu1 %v270_v31, %s1073_s9 }
 0x352   : > { %v273_v33 = vpop.permute.xlu1 %272 }
 0x353   : > { %v275_v34 = vadd.f32 %v273_v33, %v265_v32  }
 0x355   : > { %891 = vtanh.f32 %v275_v34  ;;  %v1328_v10 = vmov %v275_v34  ;;  %v336_v53 = vrot.slane (%p168_p10), %v275_v34, %v1230_v51 }
 0x357   :  { %v344_v56 = vrot.slane (%p168_p10), %v336_v53, %v1230_v51  ;;  %v337_v57 = vcombine.high (%p168_p10), %v336_v53, %v336_v53 }
 0x359   :  { %v355_v60 = vrot.slane (%p168_p10), %v344_v56, %v1232_v52  ;;  %v351_v62 = vrot.slane (%p168_p10), %v337_v57, %v1230_v51 }
 0x35b   :  { %v359_v0 = vrot.slane (%p168_p10), %v351_v62, %v1232_v52 }
 0x35f   : > { %v892_v35 = vpop.eup %891 }
 0x360   : > { %278 = vrot.lane.b32.xlu1 %v892_v35, %s1076_s12 }
 0x364   :  { %360 = vrot.lane.b32.xlu1 (%p168_p10), %v355_v60, %s1078_s2 }
 0x368   :  { %362 = vrot.lane.b32.xlu1 (%p168_p10), %v359_v0, %s1078_s2 }
 0x3d2   : > { %v279_v36 = vpop.permute.xlu1 %278 }
 0x3d3   : > { %v281_v37 = vmul.f32 %v890_v29, %v279_v36  }
 0x3d5   : > { %283 = vrot.lane.b32.xlu0 %v281_v37, %s1073_s9  ;;  %v1329_v11 = vmov %v281_v37  ;;  %v296_v54 = vrot.slane (%p168_p10), %v281_v37, %v1230_v51 }
 0x3d6   :  { %v361_v2 = vpop.permute.xlu1 (%p168_p10), %360  ;;  %v1055_v11 = vmov (%p168_p10), 0.0  }
 0x3d7   :  { %v304_v58 = vrot.slane (%p168_p10), %v296_v54, %v1230_v51  ;;  %v297_v59 = vcombine.high (%p168_p10), %v296_v54, %v296_v54  ;;  %366 = vst.msk [vmem:[#allocation11] sm:$0x1] (%p168_p10), %vm326_vm4, %v361_v2 }
 0x3d9   :  { %v315_v61 = vrot.slane (%p168_p10), %v304_v58, %v1232_v52  ;;  %v311_v63 = vrot.slane (%p168_p10), %v297_v59, %v1230_v51 }
 0x3da   :  { %v363_v4 = vpop.permute.xlu1 (%p168_p10), %362 }
 0x3db   :  { %320 = vrot.lane.b32.xlu0 (%p168_p10), %v315_v61, %s1079_s14  ;;  %v319_v1 = vrot.slane (%p168_p10), %v311_v63, %v1232_v52  ;;  %367 = vst.msk [vmem:[#allocation11 + $0x2] sm:$0x1] (%p168_p10), %vm326_vm4, %v363_v4 }
 0x3df   :  { %322 = vrot.lane.b32.xlu0 (%p168_p10), %v319_v1, %s1079_s14 }
 0x442   :  { %170 = sbr.rel (!%p168_p10) target bundleno = 278 (0x116), region = 85 }
 0x447   : > { %v284_v38 = vpop.permute.xlu0 %283 }
 0x448   : > { %288 = vst.msk [vmem:[%s286_s13] sm:$0x3] %vm287_vm3, %v284_v38 }
 0x44d   :  { %v321_v3 = vpop.permute.xlu0 %320 }
 0x44e   :  { %327 = vst.msk [vmem:[#allocation10] sm:$0x1] %vm326_vm4, %v321_v3 }
 0x44f   :  { %v368_v45 = vld [vmem:[#allocation2] sm:$0xff]  ;;  %v369_v55 = vld [vmem:[#allocation2 + $0x8] sm:$0xff] }
 0x450   :  { %778 = vmatprep.mubr.msk.f32.mxu0 %vm184_vm2, %v368_v45 }
 0x451   :  { %779 = vmatmul.mubr.msk.f32.vlgmr.msra.gmra.mrb[0].mxu0 %vm184_vm2, %v369_v55  ;;  %v323_v5 = vpop.permute.xlu0 %322 }
 0x452   :  { %328 = vst.msk [vmem:[#allocation10 + $0x2] sm:$0x1] %vm326_vm4, %v323_v5 }
 0x524   :  { %v780_v7 = vpop.f32.mrb[0].mxu0 }
 0x525   :  { %v460_v8 = vadd.f32 %v780_v7, %v726_v6  ;;  %v454_v9 = vpop.f32.mrb[1].mxu0 }
 0x526   :  { %v455_v10 = vadd.f32 %v726_v6, %v454_v9 }
 0x527   :  { %464 = vst [vmem:[#allocation3 + $0x8] sm:$0xff] %v460_v8 }
 0x528   :  { %463 = vst [vmem:[#allocation3] sm:$0xff] %v455_v10 }
 0x529 LB: > { %v476_v13 = vld [vmem:[#allocation9] sm:$0xff]  ;;  %v477_v14 = vld [vmem:[#allocation9 + $0x8] sm:$0xff]  ;;  %v478_v15 = vld [vmem:[#allocation9 + $0x10] sm:$0xff]  ;;  %v1080_v16 = vmov 0.0|0.0   ;;  %s1081_s6 = smov 32   ;;  %vm1082_vm5 = vmmov 0   ;;  %s1065_s19 = sphi %s1256_s19, %s470_s19   ;;  %v1061_v12 = vphi %v1059_v12, %v1060_v12   ;;  %v1057_v11 = vphi %v1055_v11, %v1056_v11  }
 0x52a   : > { %810 = vmatprep.subr.bf16.mxu0 %v1080_v16  ;;  %v811_v17 = vpack.c.bf16 %v477_v14, %v476_v13  ;;  %v479_v18 = vld [vmem:[#allocation9 + $0x18] sm:$0xff]  ;;  %481 = vrot.lane.b32.xlu0 %v1061_v12, %s1081_s6  ;;  %v1083_v19 = vmov 0.0   ;;  %s729_s20 = sshll.u32 %s1065_s19, 1  ;;  %s1084_s30 = smov 64  }
 0x52b   : > { %789 = vmatprep.mubr.msk.f32.mxu0 %vm1082_vm5, %v1083_v19  ;;  %v814_v20 = vpack.c.bf16 %v479_v18, %v478_v15  ;;  %s474_s1 = scalar_lea.vmem [#allocation3], %s729_s20  ;;  %s470_s19 = sadd.s32 1, %s1065_s19  }
 0x52c   : > { %812 = vmatpush3.bf16.msra.mxu0 %v811_v17  ;;  %p467_p11 = scmp.ge.s32.totalorder %s470_s19, 8  }
 0x52d   : > { %813 = vmatprep.subr.bf16.mxu0 %v1080_v16  ;;  %s1085_s21 = smov (%p467_p11), [#allocation10]   ;;  %s1086_s23 = smov (%p467_p11), [#allocation11]  }
 0x52e   :  { %s663_s22 = sshll.u32 (%p467_p11), %s1085_s21, 4  ;;  %s675_s24 = sshll.u32 (%p467_p11), %s1086_s23, 4  ;;  %s664_s22 = int_to_ptr.vmem [resolvable:$true] %s663_s22  ;;  %s1282_s24 = int_to_ptr.vmem [resolvable:$true] %s675_s24 }
 0x52f   : > { %v475_v22 = vld [vmem:[%s474_s1] sm:$0x3]  ;;  %s967_s5 = scalar_lea.vmem (%p467_p11), %s664_s22, 64  ;;  %p972_p13 = scmp.lt.s32.totalorder (%p467_p11), %s664_s22, %s664_s22 }
 0x530   : > { %815 = vmatpush3.bf16.msra.mxu0 %v814_v20  ;;  %p968_p12 = scmp.ne.s32.totalorder (%p467_p11), %s664_s22, %s967_s5  ;;  %p973_p0 = scmp.lt.s32.totalorder (%p467_p11), %s967_s5, %s967_s5 }
 0x532   :  { %p974_p1 = por (%p467_p11), %p973_p0, %p972_p13 }
 0x534   :  { %p975_p2 = pnand (%p467_p11), %p974_p1, %p968_p12 }
 0x59c   : > { %v482_v21 = vpop.permute.xlu0 %481 }
 0x59d   : > { %790 = vmatmul.mubr.msk.f32.vlgmr.msra.gmra.mrb[0].mxu0 %vm184_vm2, %v482_v21 }
 0x670   : > { %v551_v23 = vpop.f32.mrb[0].mxu0 }
 0x671   : > { %v555_v24 = vadd.f32 %v551_v23, %v475_v22  ;;  %v791_v25 = vpop.f32.mrb[1].mxu0 }
 0x673   : > { %893 = vtanh.f32 %v555_v24  ;;  %v731_v27 = vmul.f32 -1.442695, %v555_v24 }
 0x675   : > { %895 = vpow2.f32 %v731_v27 }
 0x67d   : > { %v894_v26 = vpop.eup %893 }
 0x67e   : > { %565 = vrot.lane.b32.xlu0 %v894_v26, %s1084_s30 }
 0x67f   : > { %v896_v28 = vpop.eup %895 }
 0x680   : > { %v559_v29 = vadd.f32 1.0, %v896_v28 }
 0x682   : > { %897 = vrcp.f32 %v559_v29 }
 0x68c   : > { %v898_v30 = vpop.eup %897 }
 0x68d   : > { %v563_v33 = vmul.f32 %v1057_v11, %v898_v30 }
 0x6f0   : > { %v566_v31 = vpop.permute.xlu0 %565 }
 0x6f1   : > { %v568_v32 = vmul.f32 %v898_v30, %v566_v31 }
 0x6f3   : > { %570 = vrot.lane.b32.xlu1 %v568_v32, %s1081_s6 }
 0x765   : > { %v571_v34 = vpop.permute.xlu1 %570 }
 0x766   : > { %v573_v35 = vadd.f32 %v571_v34, %v563_v33  }
 0x768   : > { %899 = vtanh.f32 %v573_v35  ;;  %v1056_v11 = vmov %v573_v35   ;;  %v626_v39 = vrot.slane (%p467_p11), %v573_v35, %v1230_v51 }
 0x76a   :  { %v634_v41 = vrot.slane (%p467_p11), %v626_v39, %v1230_v51  ;;  %v627_v43 = vcombine.high (%p467_p11), %v626_v39, %v626_v39 }
 0x76c   :  { %v645_v45 = vrot.slane (%p467_p11), %v634_v41, %v1232_v52  ;;  %v641_v47 = vrot.slane (%p467_p11), %v627_v43, %v1230_v51 }
 0x76e   :  { %v649_v49 = vrot.slane (%p467_p11), %v641_v47, %v1232_v52 }
 0x772   : > { %v900_v36 = vpop.eup %899 }
 0x773   : > { %576 = vrot.lane.b32.xlu1 %v900_v36, %s1084_s30 }
 0x777   :  { %650 = vrot.lane.b32.xlu1 (%p467_p11), %v645_v45, %s1078_s2 }
 0x77b   :  { %652 = vrot.lane.b32.xlu1 (%p467_p11), %v649_v49, %s1078_s2 }
 0x7e2   :  { %469 = sbr.rel (!%p467_p11) target bundleno = 1321 (0x529), region = 96 }
 0x7e5   : > { %v577_v37 = vpop.permute.xlu1 %576 }
 0x7e6   : > { %v579_v38 = vmul.f32 %v898_v30, %v577_v37  }
 0x7e8   : > { %v1060_v12 = vmov %v579_v38   ;;  %v587_v40 = vrot.slane (%p467_p11), %v579_v38, %v1230_v51 }
 0x7e9   :  { %v651_v53 = vpop.permute.xlu1 %650 }
 0x7ea   :  { %v595_v42 = vrot.slane %v587_v40, %v1230_v51  ;;  %v588_v44 = vcombine.high %v587_v40, %v587_v40  ;;  %656 = vst.msk [vmem:[#allocation11 + $0x1] sm:$0x1] %vm326_vm4, %v651_v53 }
 0x7ec   :  { %v606_v46 = vrot.slane %v595_v42, %v1232_v52  ;;  %v602_v48 = vrot.slane %v588_v44, %v1230_v51 }
 0x7ed   :  { %v653_v51 = vpop.permute.xlu1 %652 }
 0x7ee   :  { %611 = vrot.lane.b32.xlu0 %v606_v46, %s1079_s14  ;;  %v610_v50 = vrot.slane %v602_v48, %v1232_v52  ;;  %657 = vst.msk [vmem:[#allocation11 + $0x3] sm:$0x1] %vm326_vm4, %v653_v51 }
 0x7f2   :  { %613 = vrot.lane.b32.xlu0 %v610_v50, %s1079_s14 }
 0x860   :  { %v612_v54 = vpop.permute.xlu0 %611 }
 0x861   :  { %617 = vst.msk [vmem:[#allocation10 + $0x1] sm:$0x1] %vm326_vm4, %v612_v54 }
 0x864   :  { %v614_v55 = vpop.permute.xlu0 %613 }
 0x865   :  { %618 = vst.msk [vmem:[#allocation10 + $0x3] sm:$0x1] %vm326_vm4, %v614_v55 }
 0x866   :  { %978 = shalt.err (!%p975_p2)
}
 0x867   :  { %s979_s0 = scalar_lea.hbm %s1326_s7, 64 }
 0x868   :  { %p980_p3 = scmp.ne.s32.totalorder %s1326_s7, %s979_s0  ;;  %p983_p4 = scmp.lt.u32.totalorder %s979_s0, %s1326_s7 }
 0x86a   :  { %p985_p5 = pnand %p983_p4, %p980_p3 }
 0x86c   :  { %988 = shalt.err (!%p985_p5)
}
 0x86d   :  { %s1087_s29 = smov 2   ;;  %s989_s9 = scalar_lea.vmem %s1282_s24, 64 }
 0x86e   :  { %669 = dma.vmem_to_hbm [thread:$0]  %s664_s22, 64, %s1326_s7, [#allocation6], %s1079_s14, %s1079_s14, %s1087_s29  }
 0x86f   :  { %p990_p6 = scmp.ne.s32.totalorder %s1282_s24, %s989_s9  ;;  %p994_p7 = scmp.lt.s32.totalorder %s1282_s24, %s1282_s24 }
 0x870   :  { %p995_p8 = scmp.lt.s32.totalorder %s989_s9, %s989_s9 }
 0x872   :  { %p996_p9 = por %p995_p8, %p994_p7 }
 0x874   :  { %p997_p10 = pnand %p996_p9, %p990_p6 }
 0x876   :  { %1000 = shalt.err (!%p997_p10)
}
 0x877   :  { %s1001_s12 = scalar_lea.hbm %s1327_s8, 64 }
 0x878   :  { %p1002_p11 = scmp.ne.s32.totalorder %s1327_s8, %s1001_s12  ;;  %p1005_p12 = scmp.lt.u32.totalorder %s1001_s12, %s1327_s8 }
 0x87a   :  { %p1007_p13 = pnand %p1005_p12, %p1002_p11 }
 0x87c   :  { %1010 = shalt.err (!%p1007_p13)
}
 0x87d   :  { %681 = dma.vmem_to_hbm [thread:$0]  %s1282_s24, 64, %s1327_s8, [#allocation12], %s1079_s14, %s1079_s14, %s1087_s29  }
 0x87e   :  { %1039 = dma.done.wait [#allocation6], 64  }
 0x87f   :  { %1040 = vsyncadd [#allocation6], 4294967232 }
 0x880   :  { %1041 = dma.done.wait [#allocation12], 64  }
 0x881   :  { %1042 = vsyncadd [#allocation12], 4294967232 }
 0x882   :  { %688 = vsyncpa [#allocation5], 1 }
 0x883   :  { %689 = vsyncpa [#allocation8], 1 }
 0x884   :  { %690 = vsyncpa [#allocation6], 1 }
 0x885   :  { %691 = vsyncpa [#allocation12], 1 }

</bundles_post_ra>
